<compile_context>
chip_gen: v6e
topology: v6e:2x2x1
jax: 0.10.0
libtpu: 0.0.40
codegen_flags: <defaults>
</compile_context>

<pallas_src>
import numpy as np
import jax
import jax.numpy as jnp
from jax import lax
from jax.experimental import pallas as pl
from jax.experimental.pallas import tpu as pltpu

EPS = 1e-12


def _round_up(x, m):
    return ((x + m - 1) // m) * m


def _inv(x):
    """1/x: EUP approx reciprocal + two Newton steps (well below rtol=1e-5)."""
    r0 = pl.reciprocal(x, approx=True)
    r1 = r0 * (2.0 - x * r0)
    return r1 * (2.0 - x * r1)


def _make_kernel(n_valid, F, C, tile_s, needs_mask):
    def qc_kernel(z_ref, p2_ref, m_ref, c2_ref, pt_ref, out_ref):
        # z_ref : (F+1, TS)  rows 0..F-1 = rays^T, row F = length_scale
        # p2_ref: (C*F, F)   row c*F+k = P[c, k, :]
        # m_ref : (C, F)     M[c,f] = sum_k point[k] P[c,k,f] + q[c,f]
        # c2_ref: (C, 1)     q@point + 0.5 * point^T P point - b
        # pt_ref: (F, 1)     interior point (column)
        # out   : (F, TS)
        f32 = jnp.float32

        rays = z_ref[0:F, :]                                        # (F, TS)
        length_scale = z_ref[F:F + 1, :]                            # (1, TS)

        # --- r = rays / clamp_min(||rays||, EPS)  (EUP rsqrt) ---------------
        sumsq = jnp.sum(rays * rays, axis=0, keepdims=True)         # (1, TS)
        inv_nrm = lax.rsqrt(jnp.maximum(sumsq, EPS * EPS))          # = 1/max(||.||,EPS)
        r = rays * inv_nrm                                          # (F, TS)

        # --- beta = sigmoid(length_scale) via tanh (EUP) ---------------------
        betas = 0.5 * (jnp.tanh(0.5 * length_scale) + 1.0)          # (1, TS)

        # --- sample-dependent constraint forms (lane-dense MXU outputs) ------
        PR = jnp.dot(p2_ref[...], r, preferred_element_type=f32)    # (C*F, TS)
        # rPr[c] = sum_k r_k * (P[c] r)_k : F-wide sublane slices, no r replica
        # TODO(synk): for large C*F add a second ("arbitrary") constraint grid
        # axis with a (1, TS) running-min scratch so P2s streams per block, and
        # single-buffer the constant specs with pipeline_mode=pl.Buffered(1).
        rPr = jnp.concatenate(
            [jnp.sum(r * PR[c * F:(c + 1) * F, :], axis=0, keepdims=True)
             for c in range(C)], axis=0)                            # (C, TS)
        tPr_add_qr = jnp.dot(m_ref[...], r, preferred_element_type=f32)  # (C, TS)
        c2 = c2_ref[...]                                            # (C, 1) lane-bcast

        # --- max admissible ray length per sample -----------------------------
        d4 = jnp.square(tPr_add_qr) - rPr * (2.0 * c2)
        # TODO(synk): ZeroNaNGradientsFn is backward-only (identity in forward).
        alpha_quadratic = jnp.where(
            d4 >= 0.0,
            (-tPr_add_qr + jnp.sqrt(jnp.maximum(d4, 0.0))) * _inv(rPr),
            jnp.inf)
        alpha_linear = -c2 * _inv(tPr_add_qr)
        mu = jnp.where(jnp.abs(rPr) <= EPS, alpha_linear, alpha_quadratic)
        mu_pos = jnp.where(mu >= 0.0, mu, jnp.inf)
        max_scale = jnp.min(mu_pos, axis=0, keepdims=True)          # (1, TS)

        ls = betas * max_scale                                      # (1, TS)
        if needs_mask:
            # Padded tail columns (zero rays) give beta*inf -> NaN when scaled
            # by r=0; zero them so stored values stay finite (sliced off later).
            col = (pl.program_id(0) * tile_s
                   + lax.broadcasted_iota(jnp.int32, (1, tile_s), 1))
            ls = jnp.where(col < n_valid, ls, 0.0)

        # --- x = p + beta * max_length * r  (lane-dense store) ----------------
        out_ref[...] = pt_ref[...] + ls * r

    return qc_kernel


def qc_forward(zs, P, q, b, point, *, tile_s=None):
    """Pallas forward for QCCenterDiameterBasedNN (normalize_rays=True,
    onto_edge=False, to_01_mode='sigmoid')."""
    S = zs.shape[0]
    C, F, _ = P.shape

    zs = zs.astype(jnp.float32)
    P = P.astype(jnp.float32)
    q = q.astype(jnp.float32)
    b = b.astype(jnp.float32)
    point = point.astype(jnp.float32)

    # --- glue: fused transposed latent stream + hoisted point terms ----------
    # rows 0..F-1 = rays^T, row F = length_scale (aligned rays slice at row 0).
    z_t = jnp.concatenate([zs[:, 1:], zs[:, 0:1]], axis=1).T       # (F+1, S)
    P2s = P.reshape(C * F, F)                                      # row c*F+k = P[c,k,:]
    M = jnp.einsum('k,ckf->cf', point, P) + q                      # (C, F)
    tPt = jnp.einsum('k,ckf,f->c', point, P, point)                # (C,)
    c2 = (q @ point + 0.5 * tPt - b).reshape(C, 1)                 # (C, 1)
    pt_col = point.reshape(F, 1)                                   # (F, 1)

    # --- VMEM budget (v7x has 64 MiB physical; leave compiler headroom) ------
    try:
        cap = int(getattr(pltpu.get_tpu_info(), "vmem_capacity_bytes", 64 << 20))
    except Exception:
        cap = 64 << 20
    vmem_budget = min((3 * cap) // 4, 96 << 20)

    # --- sample tiling: lane-aligned (128) tiles sized from VMEM / stream ----
    if tile_s is None:
        per_col = 4 * (2 * (F + 1) + 2 * F + C * F + 3 * F + 8 * C + 8)
        const_bytes = 8 * (C * F * F + C * F + C + F)
        cap_cols = max(128, ((vmem_budget - const_bytes) // per_col) // 128 * 128)
        # ~2 MB of streamed latent+output per grid step (per-step cost ~0.35us).
        target = max(1024, ((2 << 20) // (4 * (2 * F + 1)) // 128) * 128)
        tile_s = min(target, cap_cols)
        if S > 256:
            # keep >= 2 grid steps so ("parallel",) shards over v7x's two TCs
            tile_s = min(tile_s, _round_up((S + 1) // 2, 128))
    tile_s = max(128, (tile_s // 128) * 128)
    tile_s = min(tile_s, _round_up(S, 128))
    S_pad = _round_up(S, tile_s)
    if S_pad != S:
        z_t = jnp.pad(z_t, ((0, 0), (0, S_pad - S)))

    kernel = _make_kernel(S, F, C, tile_s, needs_mask=(S_pad != S))

    grid = (S_pad // tile_s,)
    out = pl.pallas_call(
        kernel,
        out_shape=jax.ShapeDtypeStruct((F, S_pad), jnp.float32),
        grid_spec=pltpu.PrefetchScalarGridSpec(
            num_scalar_prefetch=0,
            grid=grid,
            in_specs=[
                pl.BlockSpec((F + 1, tile_s), lambda i: (0, i)),   # fused rays+scale
                pl.BlockSpec((C * F, F), lambda i: (0, 0)),        # P2s (constant)
                pl.BlockSpec((C, F), lambda i: (0, 0)),            # M   (constant)
                pl.BlockSpec((C, 1), lambda i: (0, 0)),            # c2  (constant)
                pl.BlockSpec((F, 1), lambda i: (0, 0)),            # point column
            ],
            out_specs=pl.BlockSpec((F, tile_s), lambda i: (0, i)),
        ),
        compiler_params=pltpu.CompilerParams(
            dimension_semantics=("parallel",),
            vmem_limit_bytes=int(vmem_budget)),
    )(z_t, P2s, M, c2, pt_col)
    return out[:, :S].T


# --- pure-JAX reference mirroring the PyTorch code ----------------------------
def qc_forward_ref(zs, P, q, b, point):
    length_scale = zs[:, 0]
    rays = zs[:, 1:]
    nrm = jnp.linalg.norm(rays, axis=1, keepdims=True)
    r = rays / jnp.maximum(nrm, EPS)
    S = zs.shape[0]
    t = jnp.tile(point[None, :], (S, 1))
    betas = jax.nn.sigmoid(length_scale)

    def quad(P, r):
        return jnp.einsum('scf,sf->sc', jnp.einsum('sf,ckf->sck', r, P), r)

    def mixed(t, P, r):
        return jnp.einsum('scf,sf->sc', jnp.einsum('sf,ckf->sck', t, P), r)

    rPr = quad(P, r)
    tPr_add_qr = mixed(t, P, r) + jnp.einsum('cf,sf->sc', q, r)
    tPt = quad(P, t)
    qt_half = jnp.einsum('cf,sf->sc', q, t) + 0.5 * tPt - b[None, :]
    d4 = jnp.square(tPr_add_qr) - rPr * (2.0 * qt_half)
    alpha_q = (-tPr_add_qr + jnp.sqrt(d4)) / rPr
    alpha_l = -qt_half / tPr_add_qr
    mu = jnp.where(jnp.abs(rPr) <= EPS, alpha_l, alpha_q)
    mu_pos = jnp.where(mu >= 0.0, mu, jnp.inf)
    max_scale = jnp.min(mu_pos, axis=1)
    ls = betas * max_scale
    return t + ls[:, None] * r


if __name__ == "__main__":
    key = jax.random.PRNGKey(0)
    k1, k2, k3, k4, k5, k6 = jax.random.split(key, 6)

    F, C = 8, 4  # n_features, n_constraints -> n_latent = F + 1

    A = jax.random.normal(k1, (C, F, F), dtype=jnp.float32)
    P = 0.1 * jnp.einsum('cij,ckj->cik', A, A) + jnp.eye(F, dtype=jnp.float32)[None]
    q = 0.1 * jax.random.normal(k2, (C, F), dtype=jnp.float32)
    b = jnp.abs(jax.random.normal(k3, (C,), dtype=jnp.float32)) + 1.0
    point = 0.1 * jax.random.normal(k4, (F,), dtype=jnp.float32)  # interior point

    # small batch: single tile, padded sample lanes (mask path)
    zs_small = jax.random.normal(k5, (8, F + 1), dtype=jnp.float32)
    xs_small = jax.block_until_ready(qc_forward(zs_small, P, q, b, point))
    np.testing.assert_allclose(
        np.asarray(xs_small), np.asarray(qc_forward_ref(zs_small, P, q, b, point)),
        rtol=1e-5, atol=1e-5)

    # larger batch: multi-step grid (>=2 for megacore) + tail padding
    zs_big = jax.random.normal(k6, (300, F + 1), dtype=jnp.float32)
    xs_big = jax.block_until_ready(qc_forward(zs_big, P, q, b, point))
    np.testing.assert_allclose(
        np.asarray(xs_big), np.asarray(qc_forward_ref(zs_big, P, q, b, point)),
        rtol=1e-5, atol=1e-5)

    print("KERNEL_OK")
</pallas_src>

<mosaic_0001>
module attributes {stable_mosaic.version = 11 : i64} {
  func.func @qc_kernel(%arg0: i32, %arg1: memref<9x128xf32, #tpu.memory_space<vmem>>, %arg2: memref<32x8xf32, #tpu.memory_space<vmem>>, %arg3: memref<4x8xf32, #tpu.memory_space<vmem>>, %arg4: memref<4x1xf32, #tpu.memory_space<vmem>>, %arg5: memref<8x1xf32, #tpu.memory_space<vmem>>, %arg6: memref<8x128xf32, #tpu.memory_space<vmem>>) attributes {dimension_semantics = [#tpu.dimension_semantics<parallel>], iteration_bounds = array<i64: 1>, scalar_prefetch = 0 : i64, scratch_operands = 0 : i64, tpu.core_type = #tpu.core_type<tc>, window_params = [{transform_indices = @transform_0, window_bounds = array<i64: 9, 128>}, {pipeline_mode = #tpu.pipeline_mode<synchronous>, transform_indices = @transform_1, window_bounds = array<i64: 32, 8>}, {pipeline_mode = #tpu.pipeline_mode<synchronous>, transform_indices = @transform_2, window_bounds = array<i64: 4, 8>}, {pipeline_mode = #tpu.pipeline_mode<synchronous>, transform_indices = @transform_3, window_bounds = array<i64: 4, 1>}, {pipeline_mode = #tpu.pipeline_mode<synchronous>, transform_indices = @transform_4, window_bounds = array<i64: 8, 1>}, {transform_indices = @transform_5, window_bounds = array<i64: 8, 128>}]} {
    %c0 = arith.constant 0 : index
    %c0_0 = arith.constant 0 : index
    %0 = vector.load %arg1[%c0, %c0_0] : memref<9x128xf32, #tpu.memory_space<vmem>>, vector<8x128xf32>
    %c8 = arith.constant 8 : index
    %c0_1 = arith.constant 0 : index
    %1 = vector.load %arg1[%c8, %c0_1] : memref<9x128xf32, #tpu.memory_space<vmem>>, vector<1x128xf32>
    %2 = arith.mulf %0, %0 : vector<8x128xf32>
    %cst = arith.constant dense<0.000000e+00> : vector<128xf32>
    %3 = vector.multi_reduction <add>, %2, %cst [0] : vector<8x128xf32> to vector<128xf32>
    %4 = vector.shape_cast %3 : vector<128xf32> to vector<1x128xf32>
    %cst_2 = arith.constant 1.000000e-24 : f32
    %5 = vector.broadcast %cst_2 : f32 to vector<1x128xf32>
    %6 = arith.maximumf %4, %5 : vector<1x128xf32>
    %7 = math.rsqrt %6 : vector<1x128xf32>
    %8 = vector.broadcast %7 : vector<1x128xf32> to vector<8x128xf32>
    %9 = arith.mulf %0, %8 : vector<8x128xf32>
    %cst_3 = arith.constant 5.000000e-01 : f32
    %10 = vector.broadcast %cst_3 : f32 to vector<1x128xf32>
    %11 = arith.mulf %10, %1 : vector<1x128xf32>
    %12 = math.tanh %11 : vector<1x128xf32>
    %cst_4 = arith.constant 1.000000e+00 : f32
    %13 = vector.broadcast %cst_4 : f32 to vector<1x128xf32>
    %14 = arith.addf %12, %13 : vector<1x128xf32>
    %cst_5 = arith.constant 5.000000e-01 : f32
    %15 = vector.broadcast %cst_5 : f32 to vector<1x128xf32>
    %16 = arith.mulf %15, %14 : vector<1x128xf32>
    %c0_6 = arith.constant 0 : index
    %c0_7 = arith.constant 0 : index
    %17 = vector.load %arg2[%c0_6, %c0_7] : memref<32x8xf32, #tpu.memory_space<vmem>>, vector<32x8xf32>
    %cst_8 = arith.constant dense<0.000000e+00> : vector<32x128xf32>
    %18 = tpu.matmul %17, %9, %cst_8 {dimension_numbers = #tpu.dot_dimension_numbers<[1], [0], [0], [1], [0, 0, 1, 1], [], []>} : vector<32x8xf32>, vector<8x128xf32>, vector<32x128xf32> -> vector<32x128xf32>
    %19 = vector.extract_strided_slice %18 {offsets = [0, 0], sizes = [8, 128], strides = [1, 1]} : vector<32x128xf32> to vector<8x128xf32>
    %20 = arith.mulf %9, %19 : vector<8x128xf32>
    %cst_9 = arith.constant dense<0.000000e+00> : vector<128xf32>
    %21 = vector.multi_reduction <add>, %20, %cst_9 [0] : vector<8x128xf32> to vector<128xf32>
    %22 = vector.shape_cast %21 : vector<128xf32> to vector<1x128xf32>
    %23 = vector.extract_strided_slice %18 {offsets = [8, 0], sizes = [8, 128], strides = [1, 1]} : vector<32x128xf32> to vector<8x128xf32>
    %24 = arith.mulf %9, %23 : vector<8x128xf32>
    %cst_10 = arith.constant dense<0.000000e+00> : vector<128xf32>
    %25 = vector.multi_reduction <add>, %24, %cst_10 [0] : vector<8x128xf32> to vector<128xf32>
    %26 = vector.shape_cast %25 : vector<128xf32> to vector<1x128xf32>
    %27 = vector.extract_strided_slice %18 {offsets = [16, 0], sizes = [8, 128], strides = [1, 1]} : vector<32x128xf32> to vector<8x128xf32>
    %28 = arith.mulf %9, %27 : vector<8x128xf32>
    %cst_11 = arith.constant dense<0.000000e+00> : vector<128xf32>
    %29 = vector.multi_reduction <add>, %28, %cst_11 [0] : vector<8x128xf32> to vector<128xf32>
    %30 = vector.shape_cast %29 : vector<128xf32> to vector<1x128xf32>
    %31 = vector.extract_strided_slice %18 {offsets = [24, 0], sizes = [8, 128], strides = [1, 1]} : vector<32x128xf32> to vector<8x128xf32>
    %32 = arith.mulf %9, %31 : vector<8x128xf32>
    %cst_12 = arith.constant dense<0.000000e+00> : vector<128xf32>
    %33 = vector.multi_reduction <add>, %32, %cst_12 [0] : vector<8x128xf32> to vector<128xf32>
    %34 = vector.shape_cast %33 : vector<128xf32> to vector<1x128xf32>
    %35 = tpu.concatenate %22, %26, %30, %34 in 0 : vector<1x128xf32>, vector<1x128xf32>, vector<1x128xf32>, vector<1x128xf32> -> vector<4x128xf32>
    %c0_13 = arith.constant 0 : index
    %c0_14 = arith.constant 0 : index
    %36 = vector.load %arg3[%c0_13, %c0_14] : memref<4x8xf32, #tpu.memory_space<vmem>>, vector<4x8xf32>
    %cst_15 = arith.constant dense<0.000000e+00> : vector<4x128xf32>
    %37 = tpu.matmul %36, %9, %cst_15 {dimension_numbers = #tpu.dot_dimension_numbers<[1], [0], [0], [1], [0, 0, 1, 1], [], []>} : vector<4x8xf32>, vector<8x128xf32>, vector<4x128xf32> -> vector<4x128xf32>
    %c0_16 = arith.constant 0 : index
    %c0_17 = arith.constant 0 : index
    %38 = vector.load %arg4[%c0_16, %c0_17] : memref<4x1xf32, #tpu.memory_space<vmem>>, vector<4x1xf32>
    %39 = arith.mulf %37, %37 : vector<4x128xf32>
    %cst_18 = arith.constant 2.000000e+00 : f32
    %40 = vector.broadcast %cst_18 : f32 to vector<4x1xf32>
    %41 = arith.mulf %40, %38 : vector<4x1xf32>
    %42 = vector.broadcast %41 : vector<4x1xf32> to vector<4x128xf32>
    %43 = arith.mulf %35, %42 : vector<4x128xf32>
    %44 = arith.subf %39, %43 : vector<4x128xf32>
    %cst_19 = arith.constant 0.000000e+00 : f32
    %45 = vector.broadcast %cst_19 : f32 to vector<4x128xf32>
    %46 = arith.cmpf oge, %44, %45 : vector<4x128xf32>
    %cst_20 = arith.constant 0.000000e+00 : f32
    %47 = vector.broadcast %cst_20 : f32 to vector<4x128xf32>
    %48 = arith.subf %47, %37 : vector<4x128xf32>
    %cst_21 = arith.constant 0.000000e+00 : f32
    %49 = vector.broadcast %cst_21 : f32 to vector<4x128xf32>
    %50 = arith.maximumf %44, %49 : vector<4x128xf32>
    %51 = math.sqrt %50 : vector<4x128xf32>
    %52 = arith.addf %48, %51 : vector<4x128xf32>
    %53 = tpu.reciprocal %35 {approx = true} : vector<4x128xf32> -> vector<4x128xf32>
    %54 = arith.mulf %35, %53 : vector<4x128xf32>
    %cst_22 = arith.constant 2.000000e+00 : f32
    %55 = vector.broadcast %cst_22 : f32 to vector<4x128xf32>
    %56 = arith.subf %55, %54 : vector<4x128xf32>
    %57 = arith.mulf %53, %56 : vector<4x128xf32>
    %58 = arith.mulf %35, %57 : vector<4x128xf32>
    %cst_23 = arith.constant 2.000000e+00 : f32
    %59 = vector.broadcast %cst_23 : f32 to vector<4x128xf32>
    %60 = arith.subf %59, %58 : vector<4x128xf32>
    %61 = arith.mulf %57, %60 : vector<4x128xf32>
    %62 = arith.mulf %52, %61 : vector<4x128xf32>
    %cst_24 = arith.constant 0x7F800000 : f32
    %63 = vector.broadcast %cst_24 : f32 to vector<4x128xf32>
    %64 = arith.select %46, %62, %63 : vector<4x128xi1>, vector<4x128xf32>
    %cst_25 = arith.constant 0.000000e+00 : f32
    %65 = vector.broadcast %cst_25 : f32 to vector<4x1xf32>
    %66 = arith.subf %65, %38 : vector<4x1xf32>
    %67 = tpu.reciprocal %37 {approx = true} : vector<4x128xf32> -> vector<4x128xf32>
    %68 = arith.mulf %37, %67 : vector<4x128xf32>
    %cst_26 = arith.constant 2.000000e+00 : f32
    %69 = vector.broadcast %cst_26 : f32 to vector<4x128xf32>
    %70 = arith.subf %69, %68 : vector<4x128xf32>
    %71 = arith.mulf %67, %70 : vector<4x128xf32>
    %72 = arith.mulf %37, %71 : vector<4x128xf32>
    %cst_27 = arith.constant 2.000000e+00 : f32
    %73 = vector.broadcast %cst_27 : f32 to vector<4x128xf32>
    %74 = arith.subf %73, %72 : vector<4x128xf32>
    %75 = arith.mulf %71, %74 : vector<4x128xf32>
    %76 = vector.broadcast %66 : vector<4x1xf32> to vector<4x128xf32>
    %77 = arith.mulf %76, %75 : vector<4x128xf32>
    %78 = math.absf %35 : vector<4x128xf32>
    %cst_28 = arith.constant 9.99999996E-13 : f32
    %79 = vector.broadcast %cst_28 : f32 to vector<4x128xf32>
    %80 = arith.cmpf ole, %78, %79 : vector<4x128xf32>
    %81 = arith.select %80, %77, %64 : vector<4x128xi1>, vector<4x128xf32>
    %cst_29 = arith.constant 0.000000e+00 : f32
    %82 = vector.broadcast %cst_29 : f32 to vector<4x128xf32>
    %83 = arith.cmpf oge, %81, %82 : vector<4x128xf32>
    %cst_30 = arith.constant 0x7F800000 : f32
    %84 = vector.broadcast %cst_30 : f32 to vector<4x128xf32>
    %85 = arith.select %83, %81, %84 : vector<4x128xi1>, vector<4x128xf32>
    %cst_31 = arith.constant dense<0x7F800000> : vector<128xf32>
    %86 = vector.multi_reduction <minimumf>, %85, %cst_31 [0] : vector<4x128xf32> to vector<128xf32>
    %87 = vector.shape_cast %86 : vector<128xf32> to vector<1x128xf32>
    %88 = arith.mulf %16, %87 : vector<1x128xf32>
    %c128_i32 = arith.constant 128 : i32
    %89 = arith.muli %arg0, %c128_i32 : i32
    %90 = tpu.iota {dimensions = array<i32: 1>} : vector<1x128xi32>
    %91 = vector.broadcast %89 : i32 to vector<1x128xi32>
    %92 = arith.addi %91, %90 : vector<1x128xi32>
    %c8_i32 = arith.constant 8 : i32
    %93 = vector.broadcast %c8_i32 : i32 to vector<1x128xi32>
    %94 = arith.cmpi slt, %92, %93 : vector<1x128xi32>
    %cst_32 = arith.constant 0.000000e+00 : f32
    %95 = vector.broadcast %cst_32 : f32 to vector<1x128xf32>
    %96 = arith.select %94, %88, %95 : vector<1x128xi1>, vector<1x128xf32>
    %c0_33 = arith.constant 0 : index
    %c0_34 = arith.constant 0 : index
    %97 = vector.load %arg5[%c0_33, %c0_34] : memref<8x1xf32, #tpu.memory_space<vmem>>, vector<8x1xf32>
    %98 = vector.broadcast %96 : vector<1x128xf32> to vector<8x128xf32>
    %99 = arith.mulf %98, %9 : vector<8x128xf32>
    %100 = vector.broadcast %97 : vector<8x1xf32> to vector<8x128xf32>
    %101 = arith.addf %100, %99 : vector<8x128xf32>
    %c0_35 = arith.constant 0 : index
    %c0_36 = arith.constant 0 : index
    %102 = vector.load %arg6[%c0_35, %c0_36] : memref<8x128xf32, #tpu.memory_space<vmem>>, vector<8x128xf32>
    tpu.vector_store %arg6[%c0_35, %c0_36], %101 {strides = array<i32>} : memref<8x128xf32, #tpu.memory_space<vmem>>, vector<8x128xf32>,
    return
  }
  func.func @transform_0(%arg0: i32) -> (i32, i32) {
    %c0_i32 = arith.constant 0 : i32
    %c0_i32_0 = arith.constant 0 : i32
    return %c0_i32, %arg0 : i32, i32
  }
  func.func @transform_1(%arg0: i32) -> (i32, i32) {
    %c0_i32 = arith.constant 0 : i32
    %c0_i32_0 = arith.constant 0 : i32
    %c0_i32_1 = arith.constant 0 : i32
    return %c0_i32, %c0_i32_0 : i32, i32
  }
  func.func @transform_2(%arg0: i32) -> (i32, i32) {
    %c0_i32 = arith.constant 0 : i32
    %c0_i32_0 = arith.constant 0 : i32
    %c0_i32_1 = arith.constant 0 : i32
    return %c0_i32, %c0_i32_0 : i32, i32
  }
  func.func @transform_3(%arg0: i32) -> (i32, i32) {
    %c0_i32 = arith.constant 0 : i32
    %c0_i32_0 = arith.constant 0 : i32
    %c0_i32_1 = arith.constant 0 : i32
    return %c0_i32, %c0_i32_0 : i32, i32
  }
  func.func @transform_4(%arg0: i32) -> (i32, i32) {
    %c0_i32 = arith.constant 0 : i32
    %c0_i32_0 = arith.constant 0 : i32
    %c0_i32_1 = arith.constant 0 : i32
    return %c0_i32, %c0_i32_0 : i32, i32
  }
  func.func @transform_5(%arg0: i32) -> (i32, i32) {
    %c0_i32 = arith.constant 0 : i32
    %c0_i32_0 = arith.constant 0 : i32
    return %c0_i32, %arg0 : i32, i32
  }
}

</mosaic_0001>

<bundles_post_ra>
// kernel: tpu_custom_call.1
= control target key start
LH: loop header
LB: loop body
LE: loop exit
PB: predicated region body
PF: predicated region fallthrough
CT: control target
= control target key end

     0   :  { %vm41_vm0 = vcmask 64512   ;;  %v402_v2 = vmov 0.0   ;;  %vm403_vm1 = vmmov 0   ;;  %v404_v4 = vmov 0   ;;  %s489_s0 = inlined_call_operand.vmem [shape: f32[9,128], index: 0, kind: input, shape index: {}]   ;;  %s490_s1 = inlined_call_operand.vmem [shape: f32[32,8], index: 1, kind: input, shape index: {}]   ;;  %s491_s2 = inlined_call_operand.vmem [shape: f32[4,8], index: 2, kind: input, shape index: {}]   ;;  %s492_s3 = inlined_call_operand.vmem [shape: f32[4,1], index: 3, kind: input, shape index: {}]   ;;  %s493_s4 = inlined_call_operand.vmem [shape: f32[8,1], index: 4, kind: input, shape index: {}]   ;;  %s494_s5 = inlined_call_operand.hbm [shape: f32[8,128], index: 5, kind: output, shape index: {}]  }
   0x1   :  { %v21_v0 = vld [vmem:[%s489_s0] sm:$0xff]  ;;  %359 = vmatprep.subr.mxu1 %v402_v2  ;;  %361 = vmatprep.mubr.msk.f32.mxu1 %vm403_vm1, %v402_v2 }
   0x2   :  { %v37_v1 = vld [vmem:[%s490_s1] sm:$0xff]  ;;  %v23_v3 = vmul.f32 %v21_v0, %v21_v0  ;;  %368 = vset.pattern.permute.xlu0 %v404_v4 }
   0x3   :  { %353 = vmatprep.mubr.msk.f32.mxu0 %vm41_vm0, %v37_v1  ;;  %v247_v5 = vld [vmem:[%s492_s3] sm:$0xf] }
   0x4   :  { %v312_v6 = vld [vmem:[%s493_s4] sm:$0xff] }
   0x5   :  { %10 = vsyncpa [#allocation3], 0  ;;  %v24_v7 = vrot.slane %v23_v3, 4  ;;  %v249_v8 = vmul.f32 2.0, %v247_v5  ;;  %369 = vset.pattern.permute.xlu1 %v404_v4  ;;  %v277_v10 = vsub.f32 0.0, %v247_v5  ;;  %v38_v19 = vld [vmem:[%s490_s1 + $0x8] sm:$0xff] }
   0x6   :  { %320 = vperm.xlu1 %369, %v312_v6   ;;  %v173_v18 = vld [vmem:[%s491_s2] sm:$0xf]  ;;  %v39_v20 = vld [vmem:[%s490_s1 + $0x10] sm:$0xff]  ;;  %v40_v21 = vld [vmem:[%s490_s1 + $0x18] sm:$0xff]  ;;  %vm167_vm2 = vcmask 1040384   ;;  %vm169_vm3 = vcmask 1041408  }
   0x7   :  { %v25_v9 = vadd.f32 %v24_v7, %v23_v3  ;;  %252 = vperm.xlu0 %368, %v249_v8   ;;  %vm171_vm4 = vcmask 1042432   ;;  %v22_v6 = vld [vmem:[%s489_s0 + $0x8] sm:$0x1]  ;;  %vm296_vm9 = vcmask 1043456   ;;  %s405_s0 = smov [#allocation2]  }
   0x8   :  { %s331_s7 = sshll.u32 %s405_s0, 4  ;;  %s332_s7 = int_to_ptr.vmem [resolvable:$true] %s331_s7 }
   0x9   :  { %v26_v11 = vrot.slane %v25_v9, 2  ;;  %s380_s8 = scalar_lea.vmem %s332_s7, 128  ;;  %p385_p1 = scmp.lt.s32.totalorder %s332_s7, %s332_s7 }
   0xa   :  { %p381_p0 = scmp.ne.s32.totalorder %s332_s7, %s380_s8  ;;  %p386_p2 = scmp.lt.s32.totalorder %s380_s8, %s380_s8 }
   0xb   :  { %v27_v12 = vadd.f32 %v26_v11, %v25_v9  ;;  %287 = vperm.xlu0 %368, %v277_v10   ;;  %v33_v9 = vmul.f32 0.5, %v22_v6 }
   0xc   :  { %p387_p3 = por %p386_p2, %p385_p1 }
   0xd   :  { %v28_v13 = vrot.slane %v27_v12, 1 }
   0xe   :  { %p388_p4 = pnand %p387_p3, %p381_p0 }
   0xf   :  { %v29_v14 = vadd.f32 %v28_v13, %v27_v12 }
  0x11   :  { %v30_v15 = vmax.f32 %v29_v14, 1e-24 }
  0x13   :  { %370 = vrsqrt.f32 %v30_v15 }
  0x20   :  { %v371_v16 = vpop.eup %370 }
  0x21   :  { %v449_v17 = vmul.f32 %v371_v16, %v21_v0 }
  0x23   :  { %351 = vmatprep.subr.mxu0 %v449_v17  ;;  %360 = vmatpush3.msra.mxu1 %v449_v17 }
  0x24   :  { %352 = vmatpush3.msra.mxu0 %v449_v17  ;;  %362 = vmatmul.mubr.msk.f32.vlgmr.msra.gmra.mxu1 %vm41_vm0, %v173_v18 }
  0x25   :  { %354 = vmatmul.mubr.msk.f32.vlgmr.msra.gmra.mxu0 %vm41_vm0, %v38_v19 }
  0x26   :  { %356 = vmatprep.mubr.msk.f32.mxu0 %vm41_vm0, %v39_v20 }
  0x29   :  { %357 = vmatmul.mubr.msk.f32.gmra.mxu0 %vm41_vm0, %v40_v21 }
  0x82   :  { %v253_v59 = vpop.permute.xlu0 %252 }
  0xe4   :  { %v470_v22 = vpop.f32.mrf.mxu1 }
  0xe5   :  { %v355_v23 = vpop.f32.mrf.mxu0  ;;  %372 = vrcp.f32 %v470_v22  ;;  %v248_v58 = vmul.f32 %v470_v22, %v470_v22  ;;  %v258_v16 = vsub.f32 0.0, %v470_v22 }
  0xe6   :  { %v146_v24 = vmul.f32 %v355_v23, %v449_v17  ;;  %v363_v25 = vpop.f32.mrf.mxu1 }
  0xe7   :  { %v120_v26 = vpop.f32.mrf.mxu0 }
  0xe8   :  { %v147_v27 = vrot.slane %v146_v24, 4  ;;  %v139_v28 = vmul.f32 %v120_v26, %v449_v17 }
  0xe9   :  { %v358_v29 = vpop.f32.mrf.mxu0 }
  0xea   :  { %v148_v30 = vadd.f32 %v147_v27, %v146_v24  ;;  %v140_v31 = vrot.slane %v139_v28, 4  ;;  %v160_v32 = vmul.f32 %v358_v29, %v449_v17  ;;  %v288_v27 = vpop.permute.xlu0 %287 }
  0xeb   :  { %v130_v33 = vpop.f32.mrf.mxu0 }
  0xec   :  { %v149_v34 = vrot.slane %v148_v30, 2  ;;  %v141_v35 = vadd.f32 %v140_v31, %v139_v28  ;;  %v161_v36 = vrot.slane %v160_v32, 4  ;;  %v153_v37 = vmul.f32 %v130_v33, %v449_v17 }
  0xee   :  { %v142_v38 = vrot.slane %v141_v35, 2  ;;  %v162_v39 = vadd.f32 %v161_v36, %v160_v32  ;;  %v154_v40 = vrot.slane %v153_v37, 4  ;;  %v150_v41 = vadd.f32 %v149_v34, %v148_v30 }
  0xf0   :  { %v143_v42 = vadd.f32 %v142_v38, %v141_v35  ;;  %v163_v43 = vrot.slane %v162_v39, 2  ;;  %v155_v44 = vadd.f32 %v154_v40, %v153_v37  ;;  %v151_v48 = vrot.slane %v150_v41, 1 }
  0xf1   :  { %v306_v35 = vlaneseq }
  0xf2   :  { %v144_v45 = vrot.slane %v143_v42, 1  ;;  %v164_v46 = vadd.f32 %v163_v43, %v162_v39  ;;  %v156_v47 = vrot.slane %v155_v44, 2  ;;  %v152_v53 = vadd.f32 %v151_v48, %v150_v41  ;;  %v373_v61 = vpop.eup %372  ;;  %v321_v48 = vpop.permute.xlu1 %320 }
  0xf3   :  { %v279_v0 = vmul.f32 %v373_v61, %v470_v22  ;;  %v307_v39 = vand.u32 127, %v306_v35  ;;  %v314_v40 = vshrl.u32 %v306_v35, 7 }
  0xf4   :  { %v157_v49 = vadd.f32 %v156_v47, %v155_v44  ;;  %v145_v50 = vadd.f32 %v144_v45, %v143_v42  ;;  %v165_v51 = vrot.slane %v164_v46, 1 }
  0xf5   :  { %v280_v2 = vsub.f32 2.0, %v279_v0  ;;  %vm310_vm11 = vcmp.lt.s32.totalorder %v307_v39, 8  ;;  %v315_v44 = vsub.s32 0, %v314_v40 }
  0xf6   :  { %v158_v52 = vrot.slane %v157_v49, 1  ;;  %v168_v55 = vsel %vm167_vm2, %v145_v50, %v152_v53  ;;  %v166_v56 = vadd.f32 %v165_v51, %v164_v46 }
  0xf7   :  { %v281_v3 = vmul.f32 %v373_v61, %v280_v2 }
  0xf8   :  { %v159_v54 = vadd.f32 %v158_v52, %v157_v49 }
  0xf9   :  { %v282_v7 = vmul.f32 %v281_v3, %v470_v22 }
  0xfa   :  { %v170_v57 = vsel %vm169_vm3, %v168_v55, %v159_v54 }
  0xfb   :  { %v172_v60 = vsel %vm171_vm4, %v170_v57, %v166_v56  ;;  %v283_v12 = vsub.f32 2.0, %v282_v7 }
  0xfc   :  { %v255_v62 = vmul.f32 %v253_v59, %v172_v60  ;;  %374 = vrcp.f32 %v172_v60  ;;  %v291_v25 = vand.u32 2147483647, %v172_v60 }
  0xfd   :  { %v284_v21 = vmul.f32 %v283_v12, %v281_v3 }
  0xfe   :  { %v256_v63 = vsub.f32 %v248_v58, %v255_v62  ;;  %vm292_vm8 = vcmp.le.f32.partialorder %v291_v25, 1e-12 }
  0xff   :  { %v290_v28 = vmul.f32 %v288_v27, %v284_v21 }
 0x100   :  { %v259_v1 = vmax.f32 %v256_v63, 0.0  ;;  %vm257_vm7 = vcmp.ge.f32.partialorder %v256_v63, 0.0 }
 0x102   :  { %376 = vrsqrt.f32 %v259_v1  ;;  %vm262_vm5 = vcmp.eq.f32.partialorder %v259_v1, inf  ;;  %v265_v15 = vand.u32 2147483648, %v259_v1  ;;  %vm264_vm6 = vcmp.eq.f32.partialorder %v259_v1, 0.0 }
 0x103   :  { %378 = vtanh.f32 %v33_v9 }
 0x109   :  { %v375_v4 = vpop.eup %374 }
 0x10a   :  { %v269_v5 = vmul.f32 %v375_v4, %v172_v60 }
 0x10c   :  { %v270_v8 = vsub.f32 2.0, %v269_v5 }
 0x10e   :  { %v271_v10 = vmul.f32 %v375_v4, %v270_v8 }
 0x10f   :  { %v377_v11 = vpop.eup %376 }
 0x110   :  { %v261_v13 = vmul.f32 %v377_v11, %v259_v1  ;;  %v272_v14 = vmul.f32 %v271_v10, %v172_v60  ;;  %v379_v33 = vpop.eup %378 }
 0x111   :  { %v35_v37 = vadd.f32 1.0, %v379_v33 }
 0x112   :  { %v263_v18 = vsel %vm262_vm5, %v259_v1, %v261_v13  ;;  %v273_v19 = vsub.f32 2.0, %v272_v14 }
 0x113   :  { %v266_v20 = vsel %vm264_vm6, %v265_v15, %v263_v18  ;;  %v36_v41 = vmul.f32 0.5, %v35_v37 }
 0x114   :  { %v267_v23 = vadd.f32 %v266_v20, %v258_v16  ;;  %v274_v24 = vmul.f32 %v273_v19, %v271_v10 }
 0x116   :  { %v275_v26 = vmul.f32 %v274_v24, %v267_v23 }
 0x118   :  { %v276_v29 = vsel %vm257_vm7, %v275_v26, inf }
 0x119   :  { %v293_v30 = vsel %vm292_vm8, %v290_v28, %v276_v29 }
 0x11a   :  { %vm294_vm10 = vcmp.ge.f32.partialorder %v293_v30, 0.0 }
 0x11b   :  { %v295_v31 = vsel %vm294_vm10, %v293_v30, inf }
 0x11c   :  { %v297_v32 = vsel %vm296_vm9, %v295_v31, inf }
 0x11d   :  { %v298_v22 = vrot.slane %v297_v32, 4 }
 0x11f   :  { %v299_v34 = vmin.f32 %v297_v32, %v298_v22 }
 0x121   :  { %v300_v36 = vrot.slane %v299_v34, 2 }
 0x123   :  { %v301_v38 = vmin.f32 %v299_v34, %v300_v36 }
 0x125   :  { %v302_v42 = vrot.slane %v301_v38, 1 }
 0x127   :  { %v303_v43 = vmin.f32 %v301_v38, %v302_v42 }
 0x129   :  { %v304_v45 = vmul.f32 %v303_v43, %v36_v41 }
 0x12b   :  { %v311_v46 = vsel %vm310_vm11, %v304_v45, 0.0 }
 0x12c   :  { %v316_v47 = vrot.slane %v311_v46, %v315_v44 }
 0x12e   :  { %v317_v49 = vmul.f32 %v316_v47, %v449_v17 }
 0x130   :  { %v323_v50 = vadd.f32 %v321_v48, %v317_v49 }
 0x132   :  { %324 = vst [vmem:[#allocation2] sm:$0xff] %v323_v50 }
 0x133   :  { %391 = shalt.err (!%p388_p4)
}
 0x134   :  { %334 = dma.vmem_to_hbm [thread:$0]  %s332_s7, 128, %s494_s5, [#allocation3]  }
 0x135   :  { %400 = dma.done.wait [#allocation3], 128  }
 0x136   :  { %401 = vsyncadd [#allocation3], 4294967168 }
 0x137   :  { %338 = vsyncpa [#allocation3], 1 }

</bundles_post_ra>
